<compile_context>
chip_gen: v6e
topology: v6e:2x2x1
jax: 0.10.0
libtpu: 0.0.40
codegen_flags: <defaults>
</compile_context>

<pallas_src>
import functools

import jax
import jax.numpy as jnp
from jax.experimental import pallas as pl
from jax.experimental.pallas import tpu as pltpu


def _dwsep_kernel(x_ref, wdw_ref, b1_ref, wpw_ref, b2_ref, o_ref, *,
                  ksz, w, l_in, use_mxu, single_slab):
    """One (batch, row-slab) step of the fused depthwise-separable conv.

    x_ref:   (1, Cin, L_pad)  flattened (H*W, zero-padded to 128n) image, resident
    wdw_ref: (Cin, KH*KW)     BN1-folded depthwise weights
    b1_ref:  (Cin, 1)         folded depthwise bias (conv bias + BN1)
    wpw_ref: (Cout, Cin)      BN2-folded pointwise weights
    b2_ref:  (Cout, 1)        folded pointwise bias (conv bias + BN2)
    o_ref:   (1, Cout, L_out) one flat, full-width row-slab of the output
    """
    cin = x_ref.shape[1]
    cout, l_out = o_ref.shape[1], o_ref.shape[2]

    # Single lane-dense slab load per step; upcast once (not per tap).
    if single_slab:
        slab = x_ref[0, :, :l_in]
    else:
        start = pl.multiple_of(pl.program_id(1) * l_out, 128)  # L_out is a 128-multiple
        slab = x_ref[0, :, pl.ds(start, l_in)]
    slab = slab.astype(jnp.float32)                             # (Cin, L_in)

    wdw = wdw_ref[...]                                          # (Cin, KH*KW)
    b1 = b1_ref[...]                                            # (Cin, 1)
    wpw = wpw_ref[...]                                          # (Cout, Cin)
    b2 = b2_ref[...]                                            # (Cout, 1)

    # ---- Depthwise conv: each (dy, dx) tap is a flat roll of the slab (XLU); one
    # VPU MAC per tap covers all Cin channels on the sublane axis.  Junk from the
    # roll wraparound only touches columns >= Wo / rows >= Ho (discarded later).
    acc = jnp.zeros((cin, l_out), jnp.float32)
    for dy in range(ksz):
        for dx in range(ksz):
            s = dy * w + dx
            tap = slab if s == 0 else pltpu.roll(slab, l_in - s, axis=1)
            j = dy * ksz + dx
            acc = acc + tap[:, :l_out] * wdw[:, j:j + 1]

    # BN1 (folded affine) + ReLU.
    dw = jnp.maximum(acc + b1, 0.0)                             # (Cin, L_out)

    # ---- Pointwise 1x1 conv.
    if use_mxu:
        # Larger channel counts: single MXU matmul, lane-dense N = L_out.
        pw = jnp.dot(wpw, dw, preferred_element_type=jnp.float32)
    else:
        # Tiny Cin/Cout: Cin broadcast-MACs on the VPU (MXU would be <2% utilized).
        pw = jnp.zeros((cout, l_out), jnp.float32)
        for ci in range(cin):
            pw = pw + wpw[:, ci:ci + 1] * dw[ci:ci + 1, :]

    # BN2 (folded affine) + ReLU; unmasked lane-dense store.
    o_ref[0] = jnp.maximum(pw + b2, 0.0).astype(o_ref.dtype)


def _vmem_capacity_bytes():
    try:
        return int(pltpu.get_tpu_info().vmem_capacity_bytes)
    except Exception:          # interpret mode / older runtimes
        return 64 << 20        # conservative: v7x per-TensorCore VMEM


def _pick_row_slab(ho, w, cin, cout, ksz, budget_bytes=4 << 20):
    """Largest row-slab TR with ho % TR == 0 and (TR*W) % 128 == 0 whose live
    f32 intermediates fit `budget_bytes`; None -> whole-image fallback."""
    best = None
    for tr in range(1, ho + 1):
        if ho % tr or (tr * w) % 128:
            continue
        l_out, l_in = tr * w, (tr + ksz - 1) * w
        live = 4 * (cin * l_in + 2 * (cin + cout) * l_out)
        if live <= budget_bytes:
            best = tr
    return best


def depthwise_separable_conv2d(x_nchw, params, kernel_size, *, row_tile=None):
    """Fused depthwise-separable conv (inference-mode BN). NCHW in, NCHW out."""
    n, cin, h, w = x_nchw.shape
    ksz = int(kernel_size)
    ho, wo = h - ksz + 1, w - ksz + 1           # Conv2d default: stride=1, padding=0
    cout = params["w_pw"].shape[0]
    eps = 1e-5

    # ---- Fold BatchNorm (running stats) + conv biases into the conv weights/biases.
    s1 = params["bn1_gamma"] / jnp.sqrt(params["bn1_var"] + eps)             # (Cin,)
    b1 = (params["b_dw"] - params["bn1_mean"]) * s1 + params["bn1_beta"]     # (Cin,)
    s2 = params["bn2_gamma"] / jnp.sqrt(params["bn2_var"] + eps)             # (Cout,)
    b2 = (params["b_pw"] - params["bn2_mean"]) * s2 + params["bn2_beta"]     # (Cout,)

    wdw = (params["w_dw"][:, 0].reshape(cin, ksz * ksz)
           * s1[:, None]).astype(jnp.float32)                                # (Cin, K*K)
    wpw = (params["w_pw"][:, :, 0, 0] * s2[:, None]).astype(jnp.float32)     # (Cout, Cin)
    b1 = b1.reshape(cin, 1).astype(jnp.float32)
    b2 = b2.reshape(cout, 1).astype(jnp.float32)

    # ---- Flatten spatial dims (free for contiguous NCHW) and pad the lane axis to a
    # multiple of 128 so every load/compute/store is lane-dense.
    hw = h * w
    l_pad = pl.cdiv(hw, 128) * 128
    x_flat = x_nchw.reshape(n, cin, hw)
    if l_pad != hw:
        x_flat = jnp.pad(x_flat, ((0, 0), (0, 0), (0, l_pad - hw)))

    # ---- Row-slab tiling of the (full-width, flat) output.
    tr = row_tile if row_tile is not None else _pick_row_slab(ho, w, cin, cout, ksz)
    if tr is None:
        # TODO(synk): non-divisor / non-128-alignable Ho currently falls back to one
        # whole-image slab; a partial tail slab would need masked stores.
        l_out, l_in, t_tiles = l_pad, l_pad, 1
        out_len = l_pad
    else:
        assert ho % tr == 0 and (tr * w) % 128 == 0, (tr, ho, w)
        l_out, l_in, t_tiles = tr * w, (tr + ksz - 1) * w, ho // tr
        out_len = t_tiles * l_out                     # = Ho * W, a multiple of L_out

    use_mxu = cin > 16 or cout > 32      # pointwise on MXU only at larger channel counts

    # ---- VMEM budget: double-buffered input image + output slab blocks, packed
    # weights, and the live in-kernel intermediates (slab, acc, dw, pw, output cast).
    cap = _vmem_capacity_bytes()
    need = 4 * (2 * cin * l_pad + 2 * cout * l_out
                + cin * l_in + 2 * cin * l_out + 3 * cout * l_out)
    need += 1 << 20                                          # packed weights + slack
    vmem_limit = int(min(cap * 3 // 4, max(32 << 20, 2 * need)))

    kernel = functools.partial(_dwsep_kernel, ksz=ksz, w=w, l_in=l_in,
                               use_mxu=use_mxu, single_slab=(t_tiles == 1))

    # TODO(synk): for images whose double-buffered (Cin, H*W) block approaches the
    # VMEM cap, the resident full image should become halo'd row-slab DMAs
    # (manual make_async_copy; BlockSpec cannot express overlapping blocks).
    out_flat = pl.pallas_call(
        kernel,
        out_shape=jax.ShapeDtypeStruct((n, cout, out_len), x_nchw.dtype),
        grid_spec=pltpu.PrefetchScalarGridSpec(
            num_scalar_prefetch=0,
            grid=(n, t_tiles),
            in_specs=[
                pl.BlockSpec((1, cin, l_pad), lambda b, t: (b, 0, 0)),    # image (flat)
                pl.BlockSpec((cin, ksz * ksz), lambda b, t: (0, 0)),      # dw weights
                pl.BlockSpec((cin, 1), lambda b, t: (0, 0)),              # dw bias
                pl.BlockSpec((cout, cin), lambda b, t: (0, 0)),           # pw weights
                pl.BlockSpec((cout, 1), lambda b, t: (0, 0)),             # pw bias
            ],
            out_specs=pl.BlockSpec((1, cout, l_out), lambda b, t: (b, 0, t)),
        ),
        compiler_params=pltpu.CompilerParams(
            # Megacore split on batch only: all row slabs of one image stay on one
            # core, so the resident image block is not duplicated across cores.
            dimension_semantics=("parallel", "arbitrary"),
            vmem_limit_bytes=vmem_limit),
    )(x_flat, wdw, b1, wpw, b2)

    # Strip junk columns (x >= Wo), junk rows (y >= Ho) and the lane padding; a
    # reshape+slice of contiguous NCHW output is cheap wrapper-side layout plumbing.
    if tr is None:
        return out_flat[:, :, :hw].reshape(n, cout, h, w)[:, :, :ho, :wo]
    return out_flat.reshape(n, cout, ho, w)[:, :, :, :wo]


def init_params(key, input_channels, output_channels, kernel_size):
    """Parameters stored in PyTorch-native layouts."""
    ks = jax.random.split(key, 12)
    cin, cout, k = input_channels, output_channels, kernel_size
    return dict(
        w_dw=jax.random.normal(ks[0], (cin, 1, k, k), jnp.float32) * 0.1,
        b_dw=jax.random.normal(ks[1], (cin,), jnp.float32) * 0.1,
        w_pw=jax.random.normal(ks[2], (cout, cin, 1, 1), jnp.float32) * 0.1,
        b_pw=jax.random.normal(ks[3], (cout,), jnp.float32) * 0.1,
        bn1_gamma=1.0 + 0.1 * jax.random.normal(ks[4], (cin,), jnp.float32),
        bn1_beta=0.1 * jax.random.normal(ks[5], (cin,), jnp.float32),
        bn1_mean=0.05 * jax.random.normal(ks[8], (cin,), jnp.float32),
        bn1_var=0.9 + 0.2 * jax.random.uniform(ks[9], (cin,), jnp.float32),
        bn2_gamma=1.0 + 0.1 * jax.random.normal(ks[6], (cout,), jnp.float32),
        bn2_beta=0.1 * jax.random.normal(ks[7], (cout,), jnp.float32),
        bn2_mean=0.05 * jax.random.normal(ks[10], (cout,), jnp.float32),
        bn2_var=0.9 + 0.2 * jax.random.uniform(ks[11], (cout,), jnp.float32),
    )


def _reference(x, params, k):
    """Pure-JAX reference mirroring the PyTorch module (inference-mode BN)."""
    eps = 1e-5
    y = jax.lax.conv_general_dilated(
        x, params["w_dw"], window_strides=(1, 1), padding="VALID",
        dimension_numbers=("NCHW", "OIHW", "NCHW"),
        feature_group_count=x.shape[1])
    y = y + params["b_dw"][None, :, None, None]
    y = (y - params["bn1_mean"][None, :, None, None]) / jnp.sqrt(
        params["bn1_var"][None, :, None, None] + eps)
    y = y * params["bn1_gamma"][None, :, None, None] + params["bn1_beta"][None, :, None, None]
    y = jnp.maximum(y, 0.0)
    z = jax.lax.conv_general_dilated(
        y, params["w_pw"], window_strides=(1, 1), padding="VALID",
        dimension_numbers=("NCHW", "OIHW", "NCHW"))
    z = z + params["b_pw"][None, :, None, None]
    z = (z - params["bn2_mean"][None, :, None, None]) / jnp.sqrt(
        params["bn2_var"][None, :, None, None] + eps)
    z = z * params["bn2_gamma"][None, :, None, None] + params["bn2_beta"][None, :, None, None]
    return jnp.maximum(z, 0.0)


if __name__ == "__main__":
    key = jax.random.PRNGKey(0)
    k_p, k_x1, k_x2, k_x3 = jax.random.split(key, 4)

    cin, cout, ksize = 4, 8, 3
    params = init_params(k_p, cin, cout, ksize)

    cases = [
        # (key, shape NCHW, forced row_tile)
        (k_x1, (2, cin, 16, 16), None),   # Ho=Wo=14: whole-image slab (padded to 256 lanes)
        (k_x2, (2, cin, 18, 18), None),   # Ho=Wo=16: whole-image slab (padded to 384 lanes)
        (k_x3, (2, cin, 18, 128), 8),     # Ho=16, Wo=126: two 8-row slabs (tiled path)
    ]
    for k_x, shp, rt in cases:
        n_, _, h_, w_ = shp
        x = jax.random.normal(k_x, shp, jnp.float32)       # NCHW, like PyTorch
        out = depthwise_separable_conv2d(x, params, ksize, row_tile=rt)
        jax.block_until_ready(out)
        ho_, wo_ = h_ - ksize + 1, w_ - ksize + 1
        assert out.shape == (n_, cout, ho_, wo_), out.shape
        ref = _reference(x, params, ksize)
        err = float(jnp.max(jnp.abs(out - ref)))
        assert err < 1e-3, f"max abs error {err} for shape {shp}"

    print("KERNEL_OK")
</pallas_src>

<mosaic_0001>
module attributes {stable_mosaic.version = 11 : i64} {
  func.func @_dwsep_kernel(%arg0: i32, %arg1: i32, %arg2: memref<1x4x256xf32, #tpu.memory_space<vmem>>, %arg3: memref<4x9xf32, #tpu.memory_space<vmem>>, %arg4: memref<4x1xf32, #tpu.memory_space<vmem>>, %arg5: memref<8x4xf32, #tpu.memory_space<vmem>>, %arg6: memref<8x1xf32, #tpu.memory_space<vmem>>, %arg7: memref<1x8x256xf32, #tpu.memory_space<vmem>>) attributes {dimension_semantics = [#tpu.dimension_semantics<parallel>, #tpu.dimension_semantics<arbitrary>], iteration_bounds = array<i64: 2, 1>, scalar_prefetch = 0 : i64, scratch_operands = 0 : i64, tpu.core_type = #tpu.core_type<tc>, window_params = [{transform_indices = @transform_0, window_bounds = array<i64: 1, 4, 256>}, {pipeline_mode = #tpu.pipeline_mode<synchronous>, transform_indices = @transform_1, window_bounds = array<i64: 4, 9>}, {pipeline_mode = #tpu.pipeline_mode<synchronous>, transform_indices = @transform_2, window_bounds = array<i64: 4, 1>}, {pipeline_mode = #tpu.pipeline_mode<synchronous>, transform_indices = @transform_3, window_bounds = array<i64: 8, 4>}, {pipeline_mode = #tpu.pipeline_mode<synchronous>, transform_indices = @transform_4, window_bounds = array<i64: 8, 1>}, {transform_indices = @transform_5, window_bounds = array<i64: 1, 8, 256>}]} {
    %c0 = arith.constant 0 : index
    %c0_0 = arith.constant 0 : index
    %c0_1 = arith.constant 0 : index
    %0 = vector.load %arg2[%c0, %c0_0, %c0_1] : memref<1x4x256xf32, #tpu.memory_space<vmem>>, vector<1x4x256xf32>
    %1 = vector.shape_cast %0 : vector<1x4x256xf32> to vector<4x256xf32>
    %c0_2 = arith.constant 0 : index
    %c0_3 = arith.constant 0 : index
    %2 = vector.load %arg3[%c0_2, %c0_3] : memref<4x9xf32, #tpu.memory_space<vmem>>, vector<4x9xf32>
    %c0_4 = arith.constant 0 : index
    %c0_5 = arith.constant 0 : index
    %3 = vector.load %arg4[%c0_4, %c0_5] : memref<4x1xf32, #tpu.memory_space<vmem>>, vector<4x1xf32>
    %c0_6 = arith.constant 0 : index
    %c0_7 = arith.constant 0 : index
    %4 = vector.load %arg5[%c0_6, %c0_7] : memref<8x4xf32, #tpu.memory_space<vmem>>, vector<8x4xf32>
    %c0_8 = arith.constant 0 : index
    %c0_9 = arith.constant 0 : index
    %5 = vector.load %arg6[%c0_8, %c0_9] : memref<8x1xf32, #tpu.memory_space<vmem>>, vector<8x1xf32>
    %cst = arith.constant 0.000000e+00 : f32
    %6 = vector.broadcast %cst : f32 to vector<4x256xf32>
    %7 = vector.extract_strided_slice %2 {offsets = [0, 0], sizes = [4, 1], strides = [1, 1]} : vector<4x9xf32> to vector<4x1xf32>
    %8 = vector.broadcast %7 : vector<4x1xf32> to vector<4x256xf32>
    %9 = arith.mulf %1, %8 : vector<4x256xf32>
    %10 = arith.addf %6, %9 : vector<4x256xf32>
    %c255_i32 = arith.constant 255 : i32
    %11 = tpu.dynamic_rotate %1 by %c255_i32 dim 1 : vector<4x256xf32>, i32 -> vector<4x256xf32>
    %12 = vector.extract_strided_slice %2 {offsets = [0, 1], sizes = [4, 1], strides = [1, 1]} : vector<4x9xf32> to vector<4x1xf32>
    %13 = vector.broadcast %12 : vector<4x1xf32> to vector<4x256xf32>
    %14 = arith.mulf %11, %13 : vector<4x256xf32>
    %15 = arith.addf %10, %14 : vector<4x256xf32>
    %c254_i32 = arith.constant 254 : i32
    %16 = tpu.dynamic_rotate %1 by %c254_i32 dim 1 : vector<4x256xf32>, i32 -> vector<4x256xf32>
    %17 = vector.extract_strided_slice %2 {offsets = [0, 2], sizes = [4, 1], strides = [1, 1]} : vector<4x9xf32> to vector<4x1xf32>
    %18 = vector.broadcast %17 : vector<4x1xf32> to vector<4x256xf32>
    %19 = arith.mulf %16, %18 : vector<4x256xf32>
    %20 = arith.addf %15, %19 : vector<4x256xf32>
    %c240_i32 = arith.constant 240 : i32
    %21 = tpu.dynamic_rotate %1 by %c240_i32 dim 1 : vector<4x256xf32>, i32 -> vector<4x256xf32>
    %22 = vector.extract_strided_slice %2 {offsets = [0, 3], sizes = [4, 1], strides = [1, 1]} : vector<4x9xf32> to vector<4x1xf32>
    %23 = vector.broadcast %22 : vector<4x1xf32> to vector<4x256xf32>
    %24 = arith.mulf %21, %23 : vector<4x256xf32>
    %25 = arith.addf %20, %24 : vector<4x256xf32>
    %c239_i32 = arith.constant 239 : i32
    %26 = tpu.dynamic_rotate %1 by %c239_i32 dim 1 : vector<4x256xf32>, i32 -> vector<4x256xf32>
    %27 = vector.extract_strided_slice %2 {offsets = [0, 4], sizes = [4, 1], strides = [1, 1]} : vector<4x9xf32> to vector<4x1xf32>
    %28 = vector.broadcast %27 : vector<4x1xf32> to vector<4x256xf32>
    %29 = arith.mulf %26, %28 : vector<4x256xf32>
    %30 = arith.addf %25, %29 : vector<4x256xf32>
    %c238_i32 = arith.constant 238 : i32
    %31 = tpu.dynamic_rotate %1 by %c238_i32 dim 1 : vector<4x256xf32>, i32 -> vector<4x256xf32>
    %32 = vector.extract_strided_slice %2 {offsets = [0, 5], sizes = [4, 1], strides = [1, 1]} : vector<4x9xf32> to vector<4x1xf32>
    %33 = vector.broadcast %32 : vector<4x1xf32> to vector<4x256xf32>
    %34 = arith.mulf %31, %33 : vector<4x256xf32>
    %35 = arith.addf %30, %34 : vector<4x256xf32>
    %c224_i32 = arith.constant 224 : i32
    %36 = tpu.dynamic_rotate %1 by %c224_i32 dim 1 : vector<4x256xf32>, i32 -> vector<4x256xf32>
    %37 = vector.extract_strided_slice %2 {offsets = [0, 6], sizes = [4, 1], strides = [1, 1]} : vector<4x9xf32> to vector<4x1xf32>
    %38 = vector.broadcast %37 : vector<4x1xf32> to vector<4x256xf32>
    %39 = arith.mulf %36, %38 : vector<4x256xf32>
    %40 = arith.addf %35, %39 : vector<4x256xf32>
    %c223_i32 = arith.constant 223 : i32
    %41 = tpu.dynamic_rotate %1 by %c223_i32 dim 1 : vector<4x256xf32>, i32 -> vector<4x256xf32>
    %42 = vector.extract_strided_slice %2 {offsets = [0, 7], sizes = [4, 1], strides = [1, 1]} : vector<4x9xf32> to vector<4x1xf32>
    %43 = vector.broadcast %42 : vector<4x1xf32> to vector<4x256xf32>
    %44 = arith.mulf %41, %43 : vector<4x256xf32>
    %45 = arith.addf %40, %44 : vector<4x256xf32>
    %c222_i32 = arith.constant 222 : i32
    %46 = tpu.dynamic_rotate %1 by %c222_i32 dim 1 : vector<4x256xf32>, i32 -> vector<4x256xf32>
    %47 = vector.extract_strided_slice %2 {offsets = [0, 8], sizes = [4, 1], strides = [1, 1]} : vector<4x9xf32> to vector<4x1xf32>
    %48 = vector.broadcast %47 : vector<4x1xf32> to vector<4x256xf32>
    %49 = arith.mulf %46, %48 : vector<4x256xf32>
    %50 = arith.addf %45, %49 : vector<4x256xf32>
    %51 = vector.broadcast %3 : vector<4x1xf32> to vector<4x256xf32>
    %52 = arith.addf %50, %51 : vector<4x256xf32>
    %cst_10 = arith.constant 0.000000e+00 : f32
    %53 = vector.broadcast %cst_10 : f32 to vector<4x256xf32>
    %54 = arith.maximumf %52, %53 : vector<4x256xf32>
    %cst_11 = arith.constant 0.000000e+00 : f32
    %55 = vector.broadcast %cst_11 : f32 to vector<8x256xf32>
    %56 = vector.extract_strided_slice %4 {offsets = [0, 0], sizes = [8, 1], strides = [1, 1]} : vector<8x4xf32> to vector<8x1xf32>
    %57 = vector.extract_strided_slice %54 {offsets = [0, 0], sizes = [1, 256], strides = [1, 1]} : vector<4x256xf32> to vector<1x256xf32>
    %58 = vector.broadcast %56 : vector<8x1xf32> to vector<8x256xf32>
    %59 = vector.broadcast %57 : vector<1x256xf32> to vector<8x256xf32>
    %60 = arith.mulf %58, %59 : vector<8x256xf32>
    %61 = arith.addf %55, %60 : vector<8x256xf32>
    %62 = vector.extract_strided_slice %4 {offsets = [0, 1], sizes = [8, 1], strides = [1, 1]} : vector<8x4xf32> to vector<8x1xf32>
    %63 = vector.extract_strided_slice %54 {offsets = [1, 0], sizes = [1, 256], strides = [1, 1]} : vector<4x256xf32> to vector<1x256xf32>
    %64 = vector.broadcast %62 : vector<8x1xf32> to vector<8x256xf32>
    %65 = vector.broadcast %63 : vector<1x256xf32> to vector<8x256xf32>
    %66 = arith.mulf %64, %65 : vector<8x256xf32>
    %67 = arith.addf %61, %66 : vector<8x256xf32>
    %68 = vector.extract_strided_slice %4 {offsets = [0, 2], sizes = [8, 1], strides = [1, 1]} : vector<8x4xf32> to vector<8x1xf32>
    %69 = vector.extract_strided_slice %54 {offsets = [2, 0], sizes = [1, 256], strides = [1, 1]} : vector<4x256xf32> to vector<1x256xf32>
    %70 = vector.broadcast %68 : vector<8x1xf32> to vector<8x256xf32>
    %71 = vector.broadcast %69 : vector<1x256xf32> to vector<8x256xf32>
    %72 = arith.mulf %70, %71 : vector<8x256xf32>
    %73 = arith.addf %67, %72 : vector<8x256xf32>
    %74 = vector.extract_strided_slice %4 {offsets = [0, 3], sizes = [8, 1], strides = [1, 1]} : vector<8x4xf32> to vector<8x1xf32>
    %75 = vector.extract_strided_slice %54 {offsets = [3, 0], sizes = [1, 256], strides = [1, 1]} : vector<4x256xf32> to vector<1x256xf32>
    %76 = vector.broadcast %74 : vector<8x1xf32> to vector<8x256xf32>
    %77 = vector.broadcast %75 : vector<1x256xf32> to vector<8x256xf32>
    %78 = arith.mulf %76, %77 : vector<8x256xf32>
    %79 = arith.addf %73, %78 : vector<8x256xf32>
    %80 = vector.broadcast %5 : vector<8x1xf32> to vector<8x256xf32>
    %81 = arith.addf %79, %80 : vector<8x256xf32>
    %cst_12 = arith.constant 0.000000e+00 : f32
    %82 = vector.broadcast %cst_12 : f32 to vector<8x256xf32>
    %83 = arith.maximumf %81, %82 : vector<8x256xf32>
    %c0_13 = arith.constant 0 : index
    %c0_14 = arith.constant 0 : index
    %c0_15 = arith.constant 0 : index
    %84 = vector.load %arg7[%c0_13, %c0_14, %c0_15] : memref<1x8x256xf32, #tpu.memory_space<vmem>>, vector<1x8x256xf32>
    %85 = vector.shape_cast %84 : vector<1x8x256xf32> to vector<8x256xf32>
    %86 = vector.shape_cast %83 : vector<8x256xf32> to vector<1x8x256xf32>
    tpu.vector_store %arg7[%c0_13, %c0_14, %c0_15], %86 {strides = array<i32>} : memref<1x8x256xf32, #tpu.memory_space<vmem>>, vector<1x8x256xf32>,
    return
  }
  func.func @transform_0(%arg0: i32, %arg1: i32) -> (i32, i32, i32) {
    %c0_i32 = arith.constant 0 : i32
    %c0_i32_0 = arith.constant 0 : i32
    %c0_i32_1 = arith.constant 0 : i32
    return %arg0, %c0_i32, %c0_i32_0 : i32, i32, i32
  }
  func.func @transform_1(%arg0: i32, %arg1: i32) -> (i32, i32) {
    %c0_i32 = arith.constant 0 : i32
    %c0_i32_0 = arith.constant 0 : i32
    %c0_i32_1 = arith.constant 0 : i32
    return %c0_i32, %c0_i32_0 : i32, i32
  }
  func.func @transform_2(%arg0: i32, %arg1: i32) -> (i32, i32) {
    %c0_i32 = arith.constant 0 : i32
    %c0_i32_0 = arith.constant 0 : i32
    %c0_i32_1 = arith.constant 0 : i32
    return %c0_i32, %c0_i32_0 : i32, i32
  }
  func.func @transform_3(%arg0: i32, %arg1: i32) -> (i32, i32) {
    %c0_i32 = arith.constant 0 : i32
    %c0_i32_0 = arith.constant 0 : i32
    %c0_i32_1 = arith.constant 0 : i32
    return %c0_i32, %c0_i32_0 : i32, i32
  }
  func.func @transform_4(%arg0: i32, %arg1: i32) -> (i32, i32) {
    %c0_i32 = arith.constant 0 : i32
    %c0_i32_0 = arith.constant 0 : i32
    %c0_i32_1 = arith.constant 0 : i32
    return %c0_i32, %c0_i32_0 : i32, i32
  }
  func.func @transform_5(%arg0: i32, %arg1: i32) -> (i32, i32, i32) {
    %c0_i32 = arith.constant 0 : i32
    %c0_i32_0 = arith.constant 0 : i32
    return %arg0, %c0_i32, %arg1 : i32, i32, i32
  }
}

</mosaic_0001>

<bundles_post_ra>
// kernel: tpu_custom_call.1
= control target key start
LH: loop header
LB: loop body
LE: loop exit
PB: predicated region body
PF: predicated region fallthrough
CT: control target
= control target key end

     0   :  { %10 = vsyncpa [#allocation3], 0  ;;  %s1020_s0 = inlined_call_operand.vmem [shape: f32[2,4,256], index: 0, kind: input, shape index: {}]   ;;  %s1021_s1 = inlined_call_operand.vmem [shape: f32[4,9], index: 1, kind: input, shape index: {}]   ;;  %s1022_s2 = inlined_call_operand.vmem [shape: f32[4,1], index: 2, kind: input, shape index: {}]   ;;  %s1023_s3 = inlined_call_operand.vmem [shape: f32[8,4], index: 3, kind: input, shape index: {}]   ;;  %s1024_s4 = inlined_call_operand.vmem [shape: f32[8,1], index: 4, kind: input, shape index: {}]   ;;  %s1025_s5 = inlined_call_operand.hbm [shape: f32[2,8,256], index: 5, kind: output, shape index: {}]  }
   0x1   :  { %12 = vsyncpa [#allocation3 + $0x1], 0  ;;  %s856_s18 = smov 0   ;;  %s858_s19 = smov 0  }
   0x2   :  { %s860_s20 = smov 0   ;;  %s862_s21 = smov 0  }
   0x3   :  { %s864_s22 = smov 0   ;;  %s866_s23 = smov 0  }
   0x4 LB: > { %s624_s24 = sadd.s32 4294967295, %s805_s23   ;;  %s625_s25 = sadd.s32 4294967294, %s805_s23   ;;  %s805_s23 = sphi %s866_s23, %s18_s23   ;;  %s801_s22 = sphi %s864_s22, %s1032_s22   ;;  %s797_s21 = sphi %s862_s21, %s1031_s21   ;;  %s793_s20 = sphi %s860_s20, %s1030_s20   ;;  %s789_s19 = sphi %s858_s19, %s1029_s19   ;;  %s785_s18 = sphi %s856_s18, %s1028_s18  }
   0x5   : > { %s30_s26 = sadd.s32 1, %s801_s22  ;;  %s149_s27 = sadd.s32 1, %s793_s20 }
   0x6   : > { %p32_p0 = scmp.ge.s32.totalorder %s30_s26, 2  ;;  %p159_p1 = scmp.ne.s32.totalorder %s793_s20, %s789_s19 }
   0x7   : > { %p160_p2 = scmp.eq.s32.totalorder %s624_s24, 1  ;;  %p165_p3 = scmp.ne.s32.totalorder %s789_s19, %s785_s18 }
   0x8   : > { %s1034_s26 = smov (%p32_p0, %s30_s26), 0  ;;  %p166_p5 = scmp.eq.s32.totalorder %s625_s25, 1 }
   0x9   : > { %p896_p4 = por %p160_p2, %p159_p1  ;;  %s144_s29 = ssub.s32 %s801_s22, %s1034_s26 }
   0xa   : > { %p628_p6 = scmp.ge.s32.totalorder %s805_s23, 1  ;;  %p147_p7 = scmp.eq.s32.totalorder %s144_s29, 0 }
   0xb   : > { %p903_p8 = por %p166_p5, %p165_p3  ;;  %p204_p9 = scmp.lt.s32.totalorder %s805_s23, 3 }
   0xc   : > { %s909_s6 = scalar_select %p147_p7, %s793_s20, %s149_s27  }
   0xd   : > { %p205_p10 = pnand %p628_p6, %p204_p9 }
   0xe   : > { %p232_p11 = scmp.lt.s32.totalorder (!%p205_p10), %s797_s21, 1  ;;  %s810_s14 = smov (!%p205_p10), 127  }
   0xf   : > { %208 = sbr.rel (%p205_p10) target bundleno = 246 (0xf6), region = 40  ;;  %s812_s15 = smov (!%p205_p10), 126  }
  0x10   : > { %s815_s16 = smov (!%p205_p10), 112   ;;  %s817_s17 = smov (!%p205_p10), 111  }
  0x11   : > { %s820_s24 = smov (!%p205_p10), 110   ;;  %s821_s25 = smov (!%p205_p10), 94  }
  0x12   : > { %s822_s7 = smov (!%p205_p10), 96  }
  0x14   : > { %v239_v0 = vld [vmem:[%s1021_s1] sm:$0xf]  ;;  %v807_v1 = vmov 2   ;;  %v808_v2 = vmov 0   ;;  %s233_s9 = scalar_select %p232_p11, %s797_s21, 1  ;;  %v809_v4 = vmov 1   ;;  %v250_v27 = vlaneseq }
  0x15   : > { %714 = vset.pattern.permute.xlu1 %v807_v1  ;;  %712 = vset.pattern.permute.xlu0 %v808_v2  ;;  %v811_v6 = vmov 3   ;;  %v813_v7 = vmov 4   ;;  %v814_v8 = vmov 5   ;;  %v816_v9 = vmov 6   ;;  %v240_v12 = vld [vmem:[%s1022_s2] sm:$0xf] }
  0x16   : > { %288 = vperm.xlu1 %714, %v239_v0   ;;  %245 = vperm.xlu0 %712, %v239_v0   ;;  %s637_s10 = sshll.u32 %s233_s9, 3  ;;  %v818_v10 = vmov 7   ;;  %v819_v11 = vmov 8   ;;  %v241_v13 = vld [vmem:[%s1023_s3] sm:$0xff]  ;;  %v824_v28 = vmov 839922192  }
  0x17   : > { %s236_s13 = scalar_lea.vmem %s1020_s0, %s637_s10  ;;  %s823_s10 = smov 95   ;;  %v242_v14 = vld [vmem:[%s1024_s4] sm:$0xff]  ;;  %v248_v29 = vunpack.c.l.s4 %v824_v28  ;;  %v945_v32 = vand.u32 127, %v250_v27  ;;  %v947_v34 = vshrl.u32 %v250_v27, 7 }
  0x18   : > { %v920_v3 = vld [vmem:[%s236_s13] sm:$0xff]  ;;  %s229_s13 = sand.u32 1, %s789_s19  }
  0x19   : > { %v258_v5 = vcombine.high %v920_v3, %v920_v3  ;;  %v249_v33 = vunpack.c.0.s8 %v248_v29  ;;  %vm266_vm0 = vcmp.lt.s32.totalorder %v945_v32, 127  ;;  %vm284_vm1 = vcmp.lt.s32.totalorder %v945_v32, 126  ;;  %s538_s29 = scalar_lea.sflag [#allocation3], %s229_s13 }
  0x1a   : > { %713 = vset.pattern.permute.xlu0 %v809_v4  ;;  %722 = vset.pattern.permute.xlu1 %v808_v2  ;;  %vm302_vm2 = vcmp.lt.s32.totalorder %v945_v32, 112  ;;  %vm320_vm3 = vcmp.lt.s32.totalorder %v945_v32, 111  ;;  %vm338_vm4 = vcmp.lt.s32.totalorder %v945_v32, 110  ;;  %vm356_vm5 = vcmp.lt.s32.totalorder %v945_v32, 96 }
  0x1b   : > { %260 = vrot.lane.b32.xlu1 %v920_v3, %s810_s14  ;;  %270 = vperm.xlu0 %713, %v239_v0   ;;  %v951_v37 = vsub.s32 %v249_v33, %v947_v34  ;;  %vm374_vm6 = vcmp.lt.s32.totalorder %v945_v32, 95  ;;  %vm392_vm7 = vcmp.lt.s32.totalorder %v945_v32, 94  ;;  %v428_v32 = vsub.s32 0, %v947_v34 }
  0x1f   : > { %262 = vrot.lane.b32.xlu1 %v258_v5, %s810_s14  ;;  %715 = vset.pattern.permute.xlu0 %v811_v6  ;;  %s629_s14 = sshll.u32 %s229_s13, 4 }
  0x20   : > { %306 = vperm.xlu0 %715, %v239_v0  }
  0x23   : > { %280 = vrot.lane.b32.xlu1 %v920_v3, %s812_s15 }
  0x24   : > { %716 = vset.pattern.permute.xlu0 %v813_v7 }
  0x25   : > { %324 = vperm.xlu0 %716, %v239_v0  }
  0x27   : > { %282 = vrot.lane.b32.xlu1 %v258_v5, %s812_s15  ;;  %s638_s15 = sshll.u32 %s797_s21, 8  ;;  %s825_s21 = smov [#allocation2]  }
  0x28   : > { %s978_s27 = scalar_lea.hbm %s1025_s5, %s638_s15  ;;  %s733_s8 = sshll.u32 %s825_s21, 4  ;;  %s734_s8 = int_to_ptr.vmem [resolvable:$false] %s733_s8 }
  0x29   : > { %717 = vset.pattern.permute.xlu0 %v814_v8  ;;  %s735_s9 = scalar_lea.vmem %s734_s8, 512 }
  0x2a   : > { %342 = vperm.xlu0 %717, %v239_v0  }
  0x2b   : > { %298 = vrot.lane.b32.xlu1 %v920_v3, %s815_s16 }
  0x2e   : > { %718 = vset.pattern.permute.xlu0 %v816_v9 }
  0x2f   : > { %300 = vrot.lane.b32.xlu1 %v258_v5, %s815_s16  ;;  %360 = vperm.xlu0 %718, %v239_v0   ;;  %s231_s16 = scalar_lea.vmem [#allocation2], %s629_s14 }
  0x33   : > { %316 = vrot.lane.b32.xlu1 %v920_v3, %s817_s17  ;;  %719 = vset.pattern.permute.xlu0 %v818_v10 }
  0x34   : > { %378 = vperm.xlu0 %719, %v239_v0  }
  0x37   : > { %318 = vrot.lane.b32.xlu1 %v258_v5, %s817_s17  ;;  %s554_s17 = sshll.u32 %s231_s16, 4  ;;  %s555_s17 = int_to_ptr.vmem [resolvable:$true] %s554_s17 }
  0x38   : > { %720 = vset.pattern.permute.xlu0 %v819_v11  ;;  %p736_p1 = scmp.lt.s32.totalorder %s555_s17, %s734_s8 }
  0x39   : > { %396 = vperm.xlu0 %720, %v239_v0  }
  0x3b   : > { %334 = vrot.lane.b32.xlu1 %v920_v3, %s820_s24 }
  0x3d   : > { %388 = vrot.lane.b32.xlu0 %v920_v3, %s821_s25 }
  0x3e   : > { %721 = vset.pattern.permute.xlu0 %v808_v2 }
  0x3f   : > { %336 = vrot.lane.b32.xlu1 %v258_v5, %s820_s24 }
  0x41   : > { %408 = vperm.xlu0 %721, %v240_v12  }
  0x43   : > { %352 = vrot.lane.b32.xlu1 %v920_v3, %s822_s7 }
  0x45   : > { %724 = vset.pattern.permute.xlu0 %v807_v1 }
  0x46   : > { %475 = vperm.xlu0 %724, %v241_v13  }
  0x47   : > { %354 = vrot.lane.b32.xlu1 %v258_v5, %s822_s7  ;;  %s729_s7 = scalar_lea.vmem %s555_s17, 256 }
  0x48   : > { %p730_p12 = scmp.ne.s32.totalorder %s555_s17, %s729_s7  ;;  %p737_p2 = scmp.lt.s32.totalorder %s735_s9, %s729_s7 }
  0x4a   : > { %727 = vset.pattern.permute.xlu0 %v808_v2  ;;  %p731_p13 = pnand %p730_p12, %p896_p4  ;;  %p738_p3 = por %p737_p2, %p736_p1 }
  0x4b   : > { %370 = vrot.lane.b32.xlu1 %v920_v3, %s823_s10 }
  0x4c   : > { %p732_p0 = pneg %p731_p13 }
  0x4e   : > { %p739_p5 = pnand %p738_p3, %p732_p0 }
  0x4f   : > { %372 = vrot.lane.b32.xlu1 %v258_v5, %s823_s10 }
  0x53   : > { %390 = vrot.lane.b32.xlu1 %v258_v5, %s821_s25 }
  0x57   : > { %422 = vperm.xlu1 %722, %v241_v13  }
  0x5b   : > { %723 = vset.pattern.permute.xlu1 %v809_v4 }
  0x5c   : > { %449 = vperm.xlu1 %723, %v241_v13  }
  0x60   : > { %725 = vset.pattern.permute.xlu1 %v811_v6 }
  0x61   : > { %501 = vperm.xlu1 %725, %v241_v13  }
  0x65   : > { %726 = vset.pattern.permute.xlu1 %v808_v2 }
  0x66   : > { %528 = vperm.xlu1 %726, %v242_v14  }
  0x91   : > { %v289_v15 = vpop.permute.xlu1 %288  ;;  %v246_v19 = vpop.permute.xlu0 %245 }
  0x92   : > { %v253_v43 = vrot.slane %v246_v19, %v951_v37 }
  0x94   : > { %v255_v54 = vmul.f32 %v253_v43, %v920_v3  ;;  %v480_v43 = vsub.s32 2, %v947_v34 }
  0x95   : > { %v261_v16 = vpop.permute.xlu1 %260 }
  0x96   : > { %v271_v21 = vpop.permute.xlu0 %270 }
  0x99   : > { %v263_v17 = vpop.permute.xlu1 %262 }
  0x9a   : > { %v267_v39 = vsel %vm266_vm0, %v261_v16, %v263_v17  ;;  %v268_v40 = vsel %vm266_vm0, %v263_v17, %v261_v16 }
  0x9b   : > { %v307_v23 = vpop.permute.xlu0 %306  ;;  %v273_v44 = vmul.f32 %v271_v21, %v267_v39  ;;  %v274_v45 = vmul.f32 %v271_v21, %v268_v40  ;;  %v432_v40 = vsub.s32 4, %v947_v34 }
  0x9d   : > { %v281_v18 = vpop.permute.xlu1 %280  ;;  %v277_v55 = vcombine.low %v273_v44, %v274_v45  ;;  %v484_v44 = vsub.s32 6, %v947_v34  ;;  %v506_v45 = vsub.s32 3, %v947_v34 }
  0x9f   : > { %v279_v4 = vadd.f32 %v277_v55, %v255_v54 }
  0xa0   : > { %v325_v25 = vpop.permute.xlu0 %324 }
  0xa1   : > { %v283_v20 = vpop.permute.xlu1 %282 }
  0xa2   : > { %v285_v41 = vsel %vm284_vm1, %v281_v18, %v283_v20  ;;  %v286_v42 = vsel %vm284_vm1, %v283_v20, %v281_v18 }
  0xa3   : > { %v291_v50 = vmul.f32 %v289_v15, %v285_v41  ;;  %v292_v51 = vmul.f32 %v289_v15, %v286_v42  ;;  %v454_v41 = vsub.s32 1, %v947_v34  ;;  %v458_v42 = vsub.s32 5, %v947_v34 }
  0xa5   : > { %v299_v22 = vpop.permute.xlu1 %298  ;;  %v343_v31 = vpop.permute.xlu0 %342  ;;  %v295_v61 = vcombine.low %v291_v50, %v292_v51 }
  0xa7   : > { %v297_v3 = vadd.f32 %v295_v61, %v279_v4 }
  0xa9   : > { %v301_v24 = vpop.permute.xlu1 %300 }
  0xaa   : > { %v361_v36 = vpop.permute.xlu0 %360  ;;  %v303_v47 = vsel %vm302_vm2, %v299_v22, %v301_v24  ;;  %v304_v48 = vsel %vm302_vm2, %v301_v24, %v299_v22 }
  0xab   : > { %v309_v56 = vmul.f32 %v307_v23, %v303_v47  ;;  %v310_v57 = vmul.f32 %v307_v23, %v304_v48 }
  0xad   : > { %v317_v26 = vpop.permute.xlu1 %316  ;;  %v313_v5 = vcombine.low %v309_v56, %v310_v57 }
  0xaf   : > { %v379_v49 = vpop.permute.xlu0 %378  ;;  %v315_v12 = vadd.f32 %v313_v5, %v297_v3 }
  0xb1   : > { %v319_v30 = vpop.permute.xlu1 %318 }
  0xb2   : > { %v321_v52 = vsel %vm320_vm3, %v317_v26, %v319_v30  ;;  %v322_v53 = vsel %vm320_vm3, %v319_v30, %v317_v26 }
  0xb3   : > { %v327_v62 = vmul.f32 %v325_v25, %v321_v52  ;;  %v328_v63 = vmul.f32 %v325_v25, %v322_v53 }
  0xb4   : > { %v397_v0 = vpop.permute.xlu0 %396 }
  0xb5   : > { %v335_v35 = vpop.permute.xlu1 %334  ;;  %v331_v9 = vcombine.low %v327_v62, %v328_v63 }
  0xb7   : > { %v333_v18 = vadd.f32 %v331_v9, %v315_v12 }
  0xb8   : > { %v389_v15 = vpop.permute.xlu0 %388 }
  0xb9   : > { %v337_v38 = vpop.permute.xlu1 %336 }
  0xba   : > { %v339_v59 = vsel %vm338_vm4, %v335_v35, %v337_v38  ;;  %v340_v60 = vsel %vm338_vm4, %v337_v38, %v335_v35 }
  0xbb   : > { %v345_v6 = vmul.f32 %v343_v31, %v339_v59  ;;  %v346_v7 = vmul.f32 %v343_v31, %v340_v60 }
  0xbc   : > { %v409_v27 = vpop.permute.xlu0 %408 }
  0xbd   : > { %v353_v46 = vpop.permute.xlu1 %352  ;;  %v349_v13 = vcombine.low %v345_v6, %v346_v7  ;;  %v416_v35 = vrot.slane %v409_v27, %v951_v37  ;;  %v510_v37 = vsub.s32 7, %v947_v34 }
  0xbf   : > { %v351_v22 = vadd.f32 %v349_v13, %v333_v18 }
  0xc1   : > { %v355_v58 = vpop.permute.xlu1 %354  ;;  %v476_v60 = vpop.permute.xlu0 %475 }
  0xc2   : > { %v357_v1 = vsel %vm356_vm5, %v353_v46, %v355_v58  ;;  %v358_v2 = vsel %vm356_vm5, %v355_v58, %v353_v46 }
  0xc3   : > { %v363_v10 = vmul.f32 %v361_v36, %v357_v1  ;;  %v364_v11 = vmul.f32 %v361_v36, %v358_v2 }
  0xc5   : > { %v371_v8 = vpop.permute.xlu1 %370  ;;  %v367_v19 = vcombine.low %v363_v10, %v364_v11 }
  0xc7   : > { %v369_v28 = vadd.f32 %v367_v19, %v351_v22 }
  0xc9   : > { %v373_v14 = vpop.permute.xlu1 %372 }
  0xca   : > { %v375_v16 = vsel %vm374_vm6, %v371_v8, %v373_v14  ;;  %v376_v17 = vsel %vm374_vm6, %v373_v14, %v371_v8 }
  0xcb   : > { %v381_v20 = vmul.f32 %v379_v49, %v375_v16  ;;  %v382_v21 = vmul.f32 %v379_v49, %v376_v17 }
  0xcd   : > { %v385_v23 = vcombine.low %v381_v20, %v382_v21  ;;  %v391_v24 = vpop.permute.xlu1 %390 }
  0xce   : > { %v393_v25 = vsel %vm392_vm7, %v389_v15, %v391_v24  ;;  %v394_v26 = vsel %vm392_vm7, %v391_v24, %v389_v15 }
  0xcf   : > { %v399_v29 = vmul.f32 %v397_v0, %v393_v25  ;;  %v400_v30 = vmul.f32 %v397_v0, %v394_v26  ;;  %v387_v33 = vadd.f32 %v385_v23, %v369_v28 }
  0xd1   : > { %v403_v31 = vcombine.low %v399_v29, %v400_v30 }
  0xd2   : > { %v423_v36 = vpop.permute.xlu1 %422 }
  0xd3   : > { %v405_v38 = vadd.f32 %v403_v31, %v387_v33 }
  0xd5   : > { %v418_v39 = vadd.f32 %v416_v35, %v405_v38 }
  0xd7   : > { %v419_v46 = vmax.f32 %v418_v39, 0.0  ;;  %v450_v47 = vpop.permute.xlu1 %449 }
  0xd9   : > { %v429_v48 = vrot.slane %v419_v46, %v428_v32  ;;  %v433_v49 = vrot.slane %v419_v46, %v432_v40  ;;  %v455_v50 = vrot.slane %v419_v46, %v454_v41  ;;  %v459_v51 = vrot.slane %v419_v46, %v458_v42 }
  0xda   : > { %v481_v52 = vrot.slane %v419_v46, %v480_v43  ;;  %v485_v53 = vrot.slane %v419_v46, %v484_v44  ;;  %v507_v54 = vrot.slane %v419_v46, %v506_v45  ;;  %v511_v55 = vrot.slane %v419_v46, %v510_v37 }
  0xdb   : > { %v439_v56 = vrot.slane %v429_v48, %v428_v32  ;;  %v443_v57 = vrot.slane %v433_v49, %v428_v32  ;;  %v465_v58 = vrot.slane %v455_v50, %v454_v41  ;;  %v469_v59 = vrot.slane %v459_v51, %v454_v41 }
  0xdc   : > { %v491_v61 = vrot.slane %v481_v52, %v480_v43  ;;  %v495_v62 = vrot.slane %v485_v53, %v480_v43  ;;  %v517_v34 = vrot.slane %v507_v54, %v506_v45  ;;  %v521_v63 = vrot.slane %v511_v55, %v506_v45  ;;  %v502_v5 = vpop.permute.xlu1 %501 }
  0xdd   : > { %v444_v0 = vmul.f32 %v439_v56, %v423_v36  ;;  %v445_v1 = vmul.f32 %v443_v57, %v423_v36  ;;  %v470_v2 = vmul.f32 %v465_v58, %v450_v47  ;;  %v471_v4 = vmul.f32 %v469_v59, %v450_v47 }
  0xde   : > { %v496_v8 = vmul.f32 %v491_v61, %v476_v60  ;;  %v497_v3 = vmul.f32 %v495_v62, %v476_v60  ;;  %v522_v11 = vmul.f32 %v517_v34, %v502_v5  ;;  %v523_v12 = vmul.f32 %v521_v63, %v502_v5 }
  0xdf   : > { %v472_v6 = vadd.f32 %v470_v2, %v444_v0  ;;  %v473_v7 = vadd.f32 %v471_v4, %v445_v1 }
  0xe1   : > { %v498_v9 = vadd.f32 %v496_v8, %v472_v6  ;;  %v499_v10 = vadd.f32 %v497_v3, %v473_v7  ;;  %v529_v13 = vpop.permute.xlu1 %528 }
  0xe3   : > { %v524_v14 = vadd.f32 %v522_v11, %v498_v9  ;;  %v525_v15 = vadd.f32 %v523_v12, %v499_v10 }
  0xe5   : > { %v531_v16 = vadd.f32 %v529_v13, %v524_v14  ;;  %v532_v17 = vadd.f32 %v529_v13, %v525_v15 }
  0xe7   : > { %v533_v18 = vmax.f32 %v531_v16, 0.0  ;;  %v534_v19 = vmax.f32 %v532_v17, 0.0 }
  0xe9   : > { %535 = vst [vmem:[%s231_s16] sm:$0xff] %v533_v18  ;;  %536 = vst [vmem:[%s231_s16 + $0x8] sm:$0xff] %v534_v19 }
  0xea   : > { %742 = shalt.err (!%p739_p5)
}
  0xeb   : > { %s743_s10 = scalar_lea.hbm %s978_s27, 256  ;;  %s747_s13 = scalar_lea.hbm %s1025_s5, 512 }
  0xec   : > { %p744_p6 = scmp.ne.s32.totalorder %s978_s27, %s743_s10  ;;  %p748_p10 = scmp.lt.s32.totalorder %s978_s27, %s1025_s5 }
  0xed   : > { %p749_p11 = scmp.lt.s32.totalorder %s747_s13, %s743_s10 }
  0xee   : > { %p745_p7 = pnand %p744_p6, %p896_p4 }
  0xef   : > { %p750_p12 = por %p749_p11, %p748_p10 }
  0xf0   : > { %p746_p9 = pneg %p745_p7 }
  0xf2   : > { %p751_p13 = pnand %p750_p12, %p746_p9 }
  0xf4   : > { %754 = shalt.err (!%p751_p13)
}
  0xf5   : > { %639 = dma.vmem_to_hbm [thread:$0]  (%p896_p4), %s555_s17, 256, %s978_s27, %s538_s29  }
  0xf6 PF: > { %p645_p0 = scmp.ge.s32.totalorder %s805_s23, 2  ;;  %s566_s16 = sand.u32 1, %s785_s18  }
  0xf7   : > { %s567_s24 = scalar_lea.sflag [#allocation3], %s566_s16 }
  0xf8   : > { %p642_p1 = pnand %p645_p0, %p903_p8 }
  0xfa   : > { %p643_p2 = pneg %p642_p1 }
  0xfc   : > { %780 = dma.done.wait (%p643_p2), %s567_s24, 256  }
  0xfd   : > { %782 = vsyncadd (%p643_p2), %s567_s24, 4294967040  ;;  %s18_s23 = sadd.s32 1, %s805_s23   ;;  %s1028_s18 = smov %s789_s19 }
  0xfe   : > { %p15_p3 = scmp.ge.s32.totalorder %s18_s23, 4   ;;  %s1029_s19 = smov %s793_s20 }
  0xff   : > { %s1030_s20 = smov %s909_s6  ;;  %s1031_s21 = smov %s801_s22 }
 0x100   : > { %s1032_s22 = smov %s1034_s26  ;;  %17 = sbr.rel (!%p15_p3) target bundleno = 4 (0x4), region = 75 }
 0x105   :  { %572 = vsyncpa [#allocation3], 1 }
 0x106   :  { %574 = vsyncpa [#allocation3 + $0x1], 1 }

</bundles_post_ra>
